<compile_context>
chip_gen: v7x
topology: tpu7x:2x2x1
jax: 0.10.0
libtpu: 0.0.40
codegen_flags: <defaults>
</compile_context>

<pallas_src>
import functools
import math

import numpy as np
import jax
import jax.numpy as jnp
from jax import lax
from jax.experimental import pallas as pl
from jax.experimental.pallas import tpu as pltpu


# ---------------------------------------------------------------------------
# Helpers
# ---------------------------------------------------------------------------
def _row_normalize_f32(t):
    """t.renorm(2, 0, 1e-5).mul(1e5):  row/||row|| if ||row||>1e-5 else row*1e5."""
    ss = jnp.sum(t * t, axis=-1, keepdims=True)
    return t * jnp.where(ss > 1e-10, lax.rsqrt(ss), 1e5)


def _default_vmem_budget():
    """Generation-aware per-TC VMEM budget for tile selection."""
    cap = 64 << 20                       # conservative fallback (v7x per-TC VMEM)
    try:
        cap = int(getattr(pltpu.get_tpu_info(), "vmem_capacity_bytes", cap))
    except Exception:
        pass
    # ~40% of physical, never above 48 MiB (v5e/v6e: 48 MiB, v7x: ~25 MiB).
    return min(int(cap * 0.4), 48 << 20)


def _vmem_estimate_bytes(tb, tn, D, w_in_bytes, out_bytes):
    # Double-buffered inputs: label ((tb,1) pads to 128 lanes), fp32 x, W tile.
    in_b = 2 * (tb * 128 * 4 + tb * D * 4 + tn * D * w_in_bytes)
    # Double-buffered output tile.
    out_b = 2 * tb * tn * out_bytes
    # ~3 full-tile fp32 epilogue temporaries (cosine / one_hot / select).
    tmp_b = 3 * tb * tn * 4
    return in_b + out_b + tmp_b


# ---------------------------------------------------------------------------
# One-shot row-renorm prep kernel (only used for W when B//tb > 4, i.e. when
# W would otherwise be re-normalized on many re-streaming passes).
# ---------------------------------------------------------------------------
def _renorm_kernel(t_ref, o_ref):
    t = t_ref[...].astype(jnp.float32)                       # (tr, D)
    ss = jnp.sum(t * t, axis=1, keepdims=True)
    o_ref[...] = (t * jnp.where(ss > 1e-10, lax.rsqrt(ss), 1e5)).astype(o_ref.dtype)


def _renorm_rows(t, out_dtype=jnp.bfloat16, vmem_budget=None):
    R, D = t.shape
    budget = vmem_budget if vmem_budget is not None else _default_vmem_budget()
    ob = np.dtype(out_dtype).itemsize
    per_row = D * (2 * 4 + 2 * ob + 4)   # db fp32 in + db out + fp32 temp
    max_tr = max(16, budget // max(per_row, 1))
    cands = [c for c in (1024, 512, 256, 128, 64, 32, 16)
             if R % c == 0 and c <= max_tr]
    tr = cands[0] if cands else R        # full-array block is always legal
    vmem_limit = int(min(max(per_row * tr + (4 << 20), 16 << 20), 56 << 20))
    return pl.pallas_call(
        _renorm_kernel,
        out_shape=jax.ShapeDtypeStruct((R, D), out_dtype),
        grid=(R // tr,),
        in_specs=[pl.BlockSpec((tr, D), lambda r: (r, 0))],
        out_specs=pl.BlockSpec((tr, D), lambda r: (r, 0)),
        compiler_params=pltpu.CompilerParams(
            dimension_semantics=("parallel",),
            vmem_limit_bytes=vmem_limit),
    )(t)


# ---------------------------------------------------------------------------
# Main fused ArcFace kernel: renorm + cosine matmul + label-column margin.
# ---------------------------------------------------------------------------
def _arcface_kernel(label_ref, x_ref, w_ref, out_ref, *,
                    cos_m, sin_m, th, mm, s, easy_margin, renorm_w):
    j = pl.program_id(1)
    tb, tn = out_ref.shape

    # Fused row renorm of the feature tile (fp32 -> unit rows -> bf16 MXU op).
    # Recomputed per step: ~3*tb*D VPU ops, negligible next to the matmul,
    # and keeps both grid axes "parallel" (no scratch / init ordering).
    xf = x_ref[...].astype(jnp.float32)                       # (tb, D)
    ssx = jnp.sum(xf * xf, axis=1, keepdims=True)
    feat = (xf * jnp.where(ssx > 1e-10, lax.rsqrt(ssx), 1e5)).astype(jnp.bfloat16)

    if renorm_w:
        wf = w_ref[...].astype(jnp.float32)                   # (tn, D) raw fp32 W
        ssw = jnp.sum(wf * wf, axis=1, keepdims=True)
        w = (wf * jnp.where(ssw > 1e-10, lax.rsqrt(ssw), 1e5)).astype(jnp.bfloat16)
    else:
        w = w_ref[...]                                        # prenormalized bf16

    # cosine = feat @ w^T: bf16 MXU operands, fp32 accumulation, contraction
    # on the shared feature dim (no materialized transpose).
    cosine = lax.dot_general(feat, w, (((1,), (1,)), ((), ())),
                             preferred_element_type=jnp.float32)
    cosine = jnp.clip(cosine, -1.0, 1.0)                      # (tb, tn) f32

    # One-hot of the label column inside this class tile; the tile offset is
    # applied to the (tb,1) labels, not to the full-tile iota.
    labels = label_ref[...] - j * tn                          # (tb, 1) int32
    one_hot = lax.broadcasted_iota(jnp.int32, (tb, tn), 1) == labels

    # Margin math only on the (tb,1) label-column cosine.  Rows whose label is
    # not in this tile get cos_lab = 0, but one_hot is all-False there so the
    # value never reaches the output.
    cos_lab = jnp.sum(jnp.where(one_hot, cosine, 0.0), axis=1, keepdims=True)
    sin_lab = jnp.sqrt(jnp.maximum(1.0 - cos_lab * cos_lab, 0.0))
    phi = cos_lab * cos_m - sin_lab * sin_m
    if easy_margin:
        phi = jnp.where(cos_lab > 0.0, phi, cos_lab)
    else:
        phi = jnp.where(cos_lab - th > 0.0, phi, cos_lab - mm)

    out_ref[...] = (jnp.where(one_hot, phi, cosine) * s).astype(out_ref.dtype)


def arcface_forward(x, label, weight, *, s=64.0, m=0.5, easy_margin=True,
                    out_dtype=jnp.bfloat16, vmem_budget=None):
    """ArcFace forward.  Returns (output [B, N] scaled by s, gt [B, 1] fp32)."""
    B, D = x.shape
    N, D2 = weight.shape
    assert D == D2
    budget = vmem_budget if vmem_budget is not None else _default_vmem_budget()
    out_bytes = np.dtype(out_dtype).itemsize

    # Tile selection: biggest tb first (halves W re-streaming per doubling),
    # then the biggest tn that fits the budget.  128 is a last-resort tn.
    tb_cands = [c for c in (1024, 512, 256, 128, 64, 32, 16, 8) if B % c == 0] or [B]
    tn_cands = [c for c in (4096, 2048, 1024, 512, 256, 128) if N % c == 0] or [N]
    tb = tn = None
    renorm_w = True
    for tb_c in tb_cands:
        rw = (B // tb_c) <= 4          # fuse W renorm unless W is re-streamed a lot
        wb = 4 if rw else 2
        for tn_c in tn_cands:
            if _vmem_estimate_bytes(tb_c, tn_c, D, wb, out_bytes) <= budget:
                tb, tn, renorm_w = tb_c, tn_c, rw
                break
        if tb is not None:
            break
    if tb is None:                      # nothing fits: smallest tiles, best effort
        tb, tn = tb_cands[-1], tn_cands[-1]
        renorm_w = (B // tb) <= 4

    w_in = weight if renorm_w else _renorm_rows(weight, jnp.bfloat16, budget)
    w_in_bytes = 4 if renorm_w else 2

    est = _vmem_estimate_bytes(tb, tn, D, w_in_bytes, out_bytes)
    vmem_limit = int(min(max(est + (8 << 20), 16 << 20), 56 << 20))

    label2d = label.reshape(B, 1).astype(jnp.int32)

    kernel = functools.partial(
        _arcface_kernel,
        cos_m=math.cos(m), sin_m=math.sin(m),
        th=math.cos(math.pi - m), mm=math.sin(math.pi - m) * m,
        s=s, easy_margin=easy_margin, renorm_w=renorm_w)

    out = pl.pallas_call(
        kernel,
        out_shape=jax.ShapeDtypeStruct((B, N), out_dtype),
        grid=(B // tb, N // tn),
        in_specs=[
            pl.BlockSpec((tb, 1), lambda i, j: (i, 0)),   # labels
            pl.BlockSpec((tb, D), lambda i, j: (i, 0)),   # x (fp32, renorm fused)
            pl.BlockSpec((tn, D), lambda i, j: (j, 0)),   # W (fp32 raw or bf16 prenorm)
        ],
        out_specs=pl.BlockSpec((tb, tn), lambda i, j: (i, j)),
        compiler_params=pltpu.CompilerParams(
            dimension_semantics=("parallel", "parallel"),
            vmem_limit_bytes=vmem_limit),
    )(label2d, x, w_in)

    # gt (clamped label-column cosine) as an O(B*D) fp32 gather-dot in the
    # wrapper -- avoids a lane-width-1 partial-store output from the kernel
    # and is actually more accurate (fp32 operands) than the old kernel path.
    feat_rows = _row_normalize_f32(x)
    w_rows = _row_normalize_f32(jnp.take(weight, label, axis=0))
    gt = jnp.clip(jnp.sum(feat_rows * w_rows, axis=1, keepdims=True), -1.0, 1.0)
    return out, gt


# ---------------------------------------------------------------------------
# Pure-JAX reference mirroring the PyTorch module.  quantize_bf16=True mirrors
# the kernel's bf16 MXU operands (fp32 accumulation) for a matched-precision
# comparison that is insensitive to margin-branch flips near the threshold.
# ---------------------------------------------------------------------------
def _arcface_reference(x, label, weight, *, s=64.0, m=0.5, easy_margin=True,
                       quantize_bf16=False):
    feat = _row_normalize_f32(x)
    nw = _row_normalize_f32(weight)
    if quantize_bf16:
        feat = feat.astype(jnp.bfloat16).astype(jnp.float32)
        nw = nw.astype(jnp.bfloat16).astype(jnp.float32)
    cosine = jnp.clip(
        jnp.matmul(feat, nw.T, precision=lax.Precision.HIGHEST), -1.0, 1.0)
    gt = jnp.take_along_axis(cosine, label[:, None], axis=1)
    sine = jnp.sqrt(jnp.maximum(1.0 - cosine ** 2, 0.0))
    phi = cosine * math.cos(m) - sine * math.sin(m)
    if easy_margin:
        phi = jnp.where(cosine > 0, phi, cosine)
    else:
        phi = jnp.where(cosine - math.cos(math.pi - m) > 0, phi,
                        cosine - math.sin(math.pi - m) * m)
    one_hot = label[:, None] == jnp.arange(cosine.shape[1])[None, :]
    out = jnp.where(one_hot, phi, cosine) * s
    return out, gt


if __name__ == "__main__":
    B, IN_FEATURE, OUT_FEATURE = 8, 128, 512

    key = jax.random.PRNGKey(0)
    kx, kw, kl = jax.random.split(key, 3)

    bound = math.sqrt(6.0 / (IN_FEATURE + OUT_FEATURE))       # xavier_uniform_
    weight = jax.random.uniform(kw, (OUT_FEATURE, IN_FEATURE),
                                minval=-bound, maxval=bound, dtype=jnp.float32)
    x = jax.random.normal(kx, (B, IN_FEATURE), dtype=jnp.float32)
    label = jax.random.randint(kl, (B,), 0, OUT_FEATURE, dtype=jnp.int32)

    out, gt = arcface_forward(x, label, weight)
    out = jax.block_until_ready(out)
    gt = jax.block_until_ready(gt)
    out_f32 = out.astype(jnp.float32)

    # (1) Matched-precision reference (bf16-quantized MXU operands): tight
    #     check covering the label columns and the margin branch.
    refq_out, _ = _arcface_reference(x, label, weight, quantize_bf16=True)
    err_q = float(jnp.max(jnp.abs(out_f32 - refq_out)))
    assert err_q < 0.35, err_q

    # (2) Pure fp32 reference on the non-label columns (no branch sensitivity;
    #     error = bf16 operand + bf16 output quantization, scaled by s=64).
    ref_out, ref_gt = _arcface_reference(x, label, weight)
    lab_mask = label[:, None] == jnp.arange(OUT_FEATURE)[None, :]
    err_f = float(jnp.max(jnp.where(lab_mask, 0.0, jnp.abs(out_f32 - ref_out))))
    assert err_f < 0.75, err_f

    # (3) gt is computed in fp32 in the wrapper -> near-exact vs reference.
    err_gt = float(jnp.max(jnp.abs(gt - ref_gt)))
    assert err_gt < 1e-4, err_gt

    print("KERNEL_OK")
</pallas_src>

<mosaic_0001>
module attributes {stable_mosaic.version = 11 : i64} {
  func.func @_arcface_kernel(%arg0: i32, %arg1: i32, %arg2: memref<8x1xi32, #tpu.memory_space<vmem>>, %arg3: memref<8x128xf32, #tpu.memory_space<vmem>>, %arg4: memref<512x128xf32, #tpu.memory_space<vmem>>, %arg5: memref<8x512xbf16, #tpu.memory_space<vmem>>) attributes {dimension_semantics = [#tpu.dimension_semantics<parallel>, #tpu.dimension_semantics<parallel>], iteration_bounds = array<i64: 1, 1>, scalar_prefetch = 0 : i64, scratch_operands = 0 : i64, tpu.core_type = #tpu.core_type<tc>, window_params = [{transform_indices = @transform_0, window_bounds = array<i64: 8, 1>}, {transform_indices = @transform_1, window_bounds = array<i64: 8, 128>}, {transform_indices = @transform_2, window_bounds = array<i64: 512, 128>}, {transform_indices = @transform_3, window_bounds = array<i64: 8, 512>}]} {
    %c0 = arith.constant 0 : index
    %c0_0 = arith.constant 0 : index
    %0 = vector.load %arg3[%c0, %c0_0] : memref<8x128xf32, #tpu.memory_space<vmem>>, vector<8x128xf32>
    %1 = arith.mulf %0, %0 : vector<8x128xf32>
    %cst = arith.constant dense<0.000000e+00> : vector<8xf32>
    %2 = vector.multi_reduction <add>, %1, %cst [1] : vector<8x128xf32> to vector<8xf32>
    %3 = vector.shape_cast %2 : vector<8xf32> to vector<8x1xf32>
    %cst_1 = arith.constant 1.000000e-10 : f32
    %4 = vector.broadcast %cst_1 : f32 to vector<8x1xf32>
    %5 = arith.cmpf ogt, %3, %4 : vector<8x1xf32>
    %6 = math.rsqrt %3 : vector<8x1xf32>
    %cst_2 = arith.constant 1.000000e+05 : f32
    %7 = vector.broadcast %cst_2 : f32 to vector<8x1xf32>
    %8 = arith.select %5, %6, %7 : vector<8x1xi1>, vector<8x1xf32>
    %9 = vector.broadcast %8 : vector<8x1xf32> to vector<8x128xf32>
    %10 = arith.mulf %0, %9 : vector<8x128xf32>
    %11 = arith.truncf %10 : vector<8x128xf32> to vector<8x128xbf16>
    %c0_3 = arith.constant 0 : index
    %c0_4 = arith.constant 0 : index
    %12 = vector.load %arg4[%c0_3, %c0_4] : memref<512x128xf32, #tpu.memory_space<vmem>>, vector<512x128xf32>
    %13 = arith.mulf %12, %12 : vector<512x128xf32>
    %cst_5 = arith.constant dense<0.000000e+00> : vector<512xf32>
    %14 = vector.multi_reduction <add>, %13, %cst_5 [1] : vector<512x128xf32> to vector<512xf32>
    %15 = vector.shape_cast %14 : vector<512xf32> to vector<512x1xf32>
    %cst_6 = arith.constant 1.000000e-10 : f32
    %16 = vector.broadcast %cst_6 : f32 to vector<512x1xf32>
    %17 = arith.cmpf ogt, %15, %16 : vector<512x1xf32>
    %18 = math.rsqrt %15 : vector<512x1xf32>
    %cst_7 = arith.constant 1.000000e+05 : f32
    %19 = vector.broadcast %cst_7 : f32 to vector<512x1xf32>
    %20 = arith.select %17, %18, %19 : vector<512x1xi1>, vector<512x1xf32>
    %21 = vector.broadcast %20 : vector<512x1xf32> to vector<512x128xf32>
    %22 = arith.mulf %12, %21 : vector<512x128xf32>
    %23 = arith.truncf %22 : vector<512x128xf32> to vector<512x128xbf16>
    %cst_8 = arith.constant dense<0.000000e+00> : vector<8x512xf32>
    %24 = tpu.matmul %11, %23, %cst_8 {dimension_numbers = #tpu.dot_dimension_numbers<[1], [1], [0], [0], [0, 0, 1, 0], [], []>} : vector<8x128xbf16>, vector<512x128xbf16>, vector<8x512xf32> -> vector<8x512xf32>
    %cst_9 = arith.constant -1.000000e+00 : f32
    %cst_10 = arith.constant 1.000000e+00 : f32
    %25 = vector.broadcast %cst_9 : f32 to vector<8x512xf32>
    %26 = arith.maximumf %25, %24 : vector<8x512xf32>
    %27 = vector.broadcast %cst_10 : f32 to vector<8x512xf32>
    %28 = arith.minimumf %27, %26 : vector<8x512xf32>
    %c0_11 = arith.constant 0 : index
    %c0_12 = arith.constant 0 : index
    %29 = vector.load %arg2[%c0_11, %c0_12] : memref<8x1xi32, #tpu.memory_space<vmem>>, vector<8x1xi32>
    %c512_i32 = arith.constant 512 : i32
    %30 = arith.muli %arg1, %c512_i32 : i32
    %31 = vector.broadcast %30 : i32 to vector<8x1xi32>
    %32 = arith.subi %29, %31 : vector<8x1xi32>
    %33 = tpu.iota {dimensions = array<i32: 1>} : vector<8x512xi32>
    %34 = vector.broadcast %32 : vector<8x1xi32> to vector<8x512xi32>
    %35 = arith.cmpi eq, %33, %34 : vector<8x512xi32>
    %cst_13 = arith.constant 0.000000e+00 : f32
    %36 = vector.broadcast %cst_13 : f32 to vector<8x512xf32>
    %37 = arith.select %35, %28, %36 : vector<8x512xi1>, vector<8x512xf32>
    %cst_14 = arith.constant dense<0.000000e+00> : vector<8xf32>
    %38 = vector.multi_reduction <add>, %37, %cst_14 [1] : vector<8x512xf32> to vector<8xf32>
    %39 = vector.shape_cast %38 : vector<8xf32> to vector<8x1xf32>
    %40 = arith.mulf %39, %39 : vector<8x1xf32>
    %cst_15 = arith.constant 1.000000e+00 : f32
    %41 = vector.broadcast %cst_15 : f32 to vector<8x1xf32>
    %42 = arith.subf %41, %40 : vector<8x1xf32>
    %cst_16 = arith.constant 0.000000e+00 : f32
    %43 = vector.broadcast %cst_16 : f32 to vector<8x1xf32>
    %44 = arith.maximumf %42, %43 : vector<8x1xf32>
    %45 = math.sqrt %44 : vector<8x1xf32>
    %cst_17 = arith.constant 0.87758255 : f32
    %46 = vector.broadcast %cst_17 : f32 to vector<8x1xf32>
    %47 = arith.mulf %39, %46 : vector<8x1xf32>
    %cst_18 = arith.constant 0.47942555 : f32
    %48 = vector.broadcast %cst_18 : f32 to vector<8x1xf32>
    %49 = arith.mulf %45, %48 : vector<8x1xf32>
    %50 = arith.subf %47, %49 : vector<8x1xf32>
    %cst_19 = arith.constant 0.000000e+00 : f32
    %51 = vector.broadcast %cst_19 : f32 to vector<8x1xf32>
    %52 = arith.cmpf ogt, %39, %51 : vector<8x1xf32>
    %53 = arith.select %52, %50, %39 : vector<8x1xi1>, vector<8x1xf32>
    %54 = vector.shape_cast %53 : vector<8x1xf32> to vector<8x1xf32>
    %55 = vector.broadcast %54 : vector<8x1xf32> to vector<8x512xf32>
    %56 = arith.select %35, %55, %28 : vector<8x512xi1>, vector<8x512xf32>
    %cst_20 = arith.constant 6.400000e+01 : f32
    %57 = vector.broadcast %cst_20 : f32 to vector<8x512xf32>
    %58 = arith.mulf %56, %57 : vector<8x512xf32>
    %59 = arith.truncf %58 : vector<8x512xf32> to vector<8x512xbf16>
    %c0_21 = arith.constant 0 : index
    %c0_22 = arith.constant 0 : index
    %60 = vector.load %arg5[%c0_21, %c0_22] : memref<8x512xbf16, #tpu.memory_space<vmem>>, vector<8x512xbf16>
    tpu.vector_store %arg5[%c0_21, %c0_22], %59 {strides = array<i32>} : memref<8x512xbf16, #tpu.memory_space<vmem>>, vector<8x512xbf16>,
    return
  }
  func.func @transform_0(%arg0: i32, %arg1: i32) -> (i32, i32) {
    %c0_i32 = arith.constant 0 : i32
    %c0_i32_0 = arith.constant 0 : i32
    return %arg0, %c0_i32 : i32, i32
  }
  func.func @transform_1(%arg0: i32, %arg1: i32) -> (i32, i32) {
    %c0_i32 = arith.constant 0 : i32
    %c0_i32_0 = arith.constant 0 : i32
    return %arg0, %c0_i32 : i32, i32
  }
  func.func @transform_2(%arg0: i32, %arg1: i32) -> (i32, i32) {
    %c0_i32 = arith.constant 0 : i32
    %c0_i32_0 = arith.constant 0 : i32
    return %arg1, %c0_i32 : i32, i32
  }
  func.func @transform_3(%arg0: i32, %arg1: i32) -> (i32, i32) {
    %c0_i32 = arith.constant 0 : i32
    return %arg0, %arg1 : i32, i32
  }
}

</mosaic_0001>

<bundles_post_ra>
// kernel: tpu_custom_call.1
= control target key start
LH: loop header
LB: loop body
LE: loop exit
PB: predicated region body
PF: predicated region fallthrough
CT: control target
= control target key end

     0   :  { %8 = vsyncpa [#allocation3], 0  ;;  %s1373_s0 = inlined_call_operand.vmem [shape: s32[8,1], index: 0, kind: input, shape index: {}]   ;;  %s1374_s1 = inlined_call_operand.vmem [shape: f32[8,128], index: 1, kind: input, shape index: {}]   ;;  %s1375_s2 = inlined_call_operand.hbm [shape: f32[512,128], index: 2, kind: input, shape index: {}]   ;;  %s1376_s3 = inlined_call_operand.hbm [shape: bf16[8,512], index: 3, kind: output, shape index: {}]  }
   0x1   :  { %9 = vsyncpa [#allocation4], 0  ;;  %s985_s12 = smov [#allocation2]   ;;  %s937_s16 = scalar_lea.hbm %s1375_s2, 8192 }
   0x2   :  { %s19_s13 = sshll.u32 %s985_s12, 4  ;;  %p938_p0 = scmp.ne.s32.totalorder %s1375_s2, %s937_s16  ;;  %s20_s13 = int_to_ptr.vmem [resolvable:$true] %s19_s13 }
   0x3   :  { %p941_p1 = scmp.lt.u32.totalorder %s937_s16, %s1375_s2 }
   0x5   :  { %p943_p2 = pnand %p941_p1, %p938_p0 }
   0x7   :  { %946 = shalt.err (!%p943_p2)
}
   0x8   :  { %s947_s21 = scalar_lea.vmem %s20_s13, 8192  ;;  %p952_p4 = scmp.lt.s32.totalorder %s20_s13, %s20_s13 }
   0x9   :  { %p948_p3 = scmp.ne.s32.totalorder %s20_s13, %s947_s21  ;;  %p953_p5 = scmp.lt.s32.totalorder %s947_s21, %s947_s21 }
   0xb   :  { %p954_p6 = por %p953_p5, %p952_p4 }
   0xd   :  { %p955_p7 = pnand %p954_p6, %p948_p3 }
   0xf   :  { %958 = shalt.err (!%p955_p7)
}
  0x10   :  { %s986_s22 = smov 128   ;;  %s987_s23 = smov 8  }
  0x11   :  { %25 = dma.hbm_to_vmem [thread:$0]  %s1375_s2, 8192, %s20_s13, [#allocation3], %s986_s22, %s986_s22, %s987_s23  }
  0x12   :  { %981 = dma.done.wait [#allocation3], 8192  }
  0x13   :  { %982 = vsyncadd [#allocation3], 4294959104  ;;  %v1022_v0 = vld [vmem:[#allocation2 + $0x80] sm:$0xff]  ;;  %v1026_v2 = vld [vmem:[#allocation2 + $0x88] sm:$0xff] }
  0x14   :  { %v1024_v1 = vld [vmem:[#allocation2] sm:$0xff]  ;;  %v119_v3 = vmul.f32 %v1022_v0, %v1022_v0  ;;  %v1032_v5 = vld [vmem:[#allocation2 + $0x8] sm:$0xff]  ;;  %v120_v6 = vmul.f32 %v1026_v2, %v1026_v2  ;;  %v1054_v16 = vld [vmem:[#allocation2 + $0x90] sm:$0xff] }
  0x15   :  { %v103_v4 = vmul.f32 %v1024_v1, %v1024_v1  ;;  %v104_v7 = vmul.f32 %v1032_v5, %v1032_v5  ;;  %v1038_v8 = vld [vmem:[#allocation2 + $0x180] sm:$0xff]  ;;  %v1040_v9 = vld [vmem:[#allocation2 + $0x188] sm:$0xff]  ;;  %v1056_v17 = vld [vmem:[#allocation2 + $0x98] sm:$0xff]  ;;  %v121_v18 = vmul.f32 %v1054_v16, %v1054_v16 }
  0x16   :  { %199 = vadd.xlane.f32.xlu0 %v119_v3  ;;  %v151_v10 = vmul.f32 %v1038_v8, %v1038_v8  ;;  %v152_v11 = vmul.f32 %v1040_v9, %v1040_v9  ;;  %v1046_v12 = vld [vmem:[#allocation2 + $0x100] sm:$0xff]  ;;  %v1048_v13 = vld [vmem:[#allocation2 + $0x108] sm:$0xff]  ;;  %v122_v19 = vmul.f32 %v1056_v17, %v1056_v17  ;;  %v1062_v20 = vld [vmem:[#allocation2 + $0x10] sm:$0xff] }
  0x17   :  { %167 = vadd.xlane.f32.xlu1 %v103_v4  ;;  %v135_v14 = vmul.f32 %v1046_v12, %v1046_v12  ;;  %v136_v15 = vmul.f32 %v1048_v13, %v1048_v13  ;;  %v1064_v21 = vld [vmem:[#allocation2 + $0x18] sm:$0xff]  ;;  %v105_v22 = vmul.f32 %v1062_v20, %v1062_v20  ;;  %v1070_v24 = vld [vmem:[#allocation2 + $0x190] sm:$0xff]  ;;  %v1086_v32 = vld [vmem:[#allocation2 + $0xa0] sm:$0xff] }
  0x18   :  { %v106_v23 = vmul.f32 %v1064_v21, %v1064_v21  ;;  %v1072_v25 = vld [vmem:[#allocation2 + $0x198] sm:$0xff]  ;;  %v153_v26 = vmul.f32 %v1070_v24, %v1070_v24  ;;  %v1078_v28 = vld [vmem:[#allocation2 + $0x110] sm:$0xff]  ;;  %v1088_v33 = vld [vmem:[#allocation2 + $0xa8] sm:$0xff]  ;;  %v123_v34 = vmul.f32 %v1086_v32, %v1086_v32 }
  0x19   :  { %v154_v27 = vmul.f32 %v1072_v25, %v1072_v25  ;;  %v1080_v29 = vld [vmem:[#allocation2 + $0x118] sm:$0xff]  ;;  %v137_v30 = vmul.f32 %v1078_v28, %v1078_v28  ;;  %v124_v35 = vmul.f32 %v1088_v33, %v1088_v33  ;;  %v1094_v36 = vld [vmem:[#allocation2 + $0x20] sm:$0xff]  ;;  %v1096_v37 = vld [vmem:[#allocation2 + $0x28] sm:$0xff] }
  0x1a   :  { %201 = vadd.xlane.f32.xlu0 %v120_v6  ;;  %v138_v31 = vmul.f32 %v1080_v29, %v1080_v29  ;;  %v107_v38 = vmul.f32 %v1094_v36, %v1094_v36  ;;  %v108_v39 = vmul.f32 %v1096_v37, %v1096_v37  ;;  %v1102_v40 = vld [vmem:[#allocation2 + $0x1a0] sm:$0xff]  ;;  %v1104_v41 = vld [vmem:[#allocation2 + $0x1a8] sm:$0xff]  ;;  %v1118_v48 = vld [vmem:[#allocation2 + $0xb0] sm:$0xff] }
  0x1b   :  { %169 = vadd.xlane.f32.xlu1 %v104_v7  ;;  %v155_v42 = vmul.f32 %v1102_v40, %v1102_v40  ;;  %v156_v43 = vmul.f32 %v1104_v41, %v1104_v41  ;;  %v1110_v44 = vld [vmem:[#allocation2 + $0x120] sm:$0xff]  ;;  %v1112_v45 = vld [vmem:[#allocation2 + $0x128] sm:$0xff]  ;;  %v1120_v49 = vld [vmem:[#allocation2 + $0xb8] sm:$0xff]  ;;  %v125_v50 = vmul.f32 %v1118_v48, %v1118_v48 }
  0x1c   :  { %v139_v46 = vmul.f32 %v1110_v44, %v1110_v44  ;;  %v140_v47 = vmul.f32 %v1112_v45, %v1112_v45  ;;  %v126_v51 = vmul.f32 %v1120_v49, %v1120_v49  ;;  %v1126_v52 = vld [vmem:[#allocation2 + $0x30] sm:$0xff]  ;;  %v1128_v53 = vld [vmem:[#allocation2 + $0x38] sm:$0xff]  ;;  %v1150_v3 = vld [vmem:[#allocation2 + $0xc0] sm:$0xff] }
  0x1d   :  { %v109_v54 = vmul.f32 %v1126_v52, %v1126_v52  ;;  %v110_v55 = vmul.f32 %v1128_v53, %v1128_v53  ;;  %v1134_v56 = vld [vmem:[#allocation2 + $0x1b0] sm:$0xff]  ;;  %v1136_v57 = vld [vmem:[#allocation2 + $0x1b8] sm:$0xff]  ;;  %v1152_v4 = vld [vmem:[#allocation2 + $0xc8] sm:$0xff]  ;;  %v127_v6 = vmul.f32 %v1150_v3, %v1150_v3 }
  0x1e   :  { %263 = vadd.xlane.f32.xlu0 %v151_v10  ;;  %v157_v58 = vmul.f32 %v1134_v56, %v1134_v56  ;;  %v158_v59 = vmul.f32 %v1136_v57, %v1136_v57  ;;  %v1142_v60 = vld [vmem:[#allocation2 + $0x130] sm:$0xff]  ;;  %v1144_v61 = vld [vmem:[#allocation2 + $0x138] sm:$0xff]  ;;  %v128_v7 = vmul.f32 %v1152_v4, %v1152_v4  ;;  %v1158_v10 = vld [vmem:[#allocation2 + $0x40] sm:$0xff] }
  0x1f   :  { %265 = vadd.xlane.f32.xlu1 %v152_v11  ;;  %v141_v62 = vmul.f32 %v1142_v60, %v1142_v60  ;;  %v142_v63 = vmul.f32 %v1144_v61, %v1144_v61  ;;  %v1160_v11 = vld [vmem:[#allocation2 + $0x48] sm:$0xff] }
  0x22   :  { %231 = vadd.xlane.f32.xlu0 %v135_v14  ;;  %v111_v14 = vmul.f32 %v1158_v10, %v1158_v10 }
  0x23   :  { %233 = vadd.xlane.f32.xlu1 %v136_v15  ;;  %v112_v15 = vmul.f32 %v1160_v11, %v1160_v11 }
  0x26   :  { %203 = vadd.xlane.f32.xlu0 %v121_v18  ;;  %v1166_v18 = vld [vmem:[#allocation2 + $0x1c0] sm:$0xff] }
  0x27   :  { %205 = vadd.xlane.f32.xlu1 %v122_v19  ;;  %v1168_v19 = vld [vmem:[#allocation2 + $0x1c8] sm:$0xff] }
  0x2a   :  { %171 = vadd.xlane.f32.xlu0 %v105_v22  ;;  %v159_v22 = vmul.f32 %v1166_v18, %v1166_v18 }
  0x2b   :  { %173 = vadd.xlane.f32.xlu1 %v106_v23  ;;  %v160_v23 = vmul.f32 %v1168_v19, %v1168_v19 }
  0x2e   :  { %267 = vadd.xlane.f32.xlu0 %v153_v26  ;;  %v1174_v26 = vld [vmem:[#allocation2 + $0x140] sm:$0xff] }
  0x2f   :  { %269 = vadd.xlane.f32.xlu1 %v154_v27  ;;  %v1176_v27 = vld [vmem:[#allocation2 + $0x148] sm:$0xff] }
  0x32   :  { %235 = vadd.xlane.f32.xlu0 %v137_v30  ;;  %v143_v30 = vmul.f32 %v1174_v26, %v1174_v26 }
  0x33   :  { %237 = vadd.xlane.f32.xlu1 %v138_v31  ;;  %v144_v31 = vmul.f32 %v1176_v27, %v1176_v27 }
  0x36   :  { %207 = vadd.xlane.f32.xlu0 %v123_v34  ;;  %v1182_v34 = vld [vmem:[#allocation2 + $0xd0] sm:$0xff] }
  0x37   :  { %209 = vadd.xlane.f32.xlu1 %v124_v35  ;;  %v1184_v35 = vld [vmem:[#allocation2 + $0xd8] sm:$0xff] }
  0x3a   :  { %175 = vadd.xlane.f32.xlu0 %v107_v38  ;;  %v129_v38 = vmul.f32 %v1182_v34, %v1182_v34 }
  0x3b   :  { %177 = vadd.xlane.f32.xlu1 %v108_v39  ;;  %v130_v39 = vmul.f32 %v1184_v35, %v1184_v35 }
  0x3e   :  { %271 = vadd.xlane.f32.xlu0 %v155_v42  ;;  %v1190_v42 = vld [vmem:[#allocation2 + $0x50] sm:$0xff] }
  0x3f   :  { %273 = vadd.xlane.f32.xlu1 %v156_v43  ;;  %1400 = vst [vmem:[#allocation8_spill] sm:$0xff] %v1190_v42  ;;  %v1192_v43 = vld [vmem:[#allocation2 + $0x58] sm:$0xff] }
  0x40   :  { %1401 = vst [vmem:[#allocation9_spill] sm:$0xff] %v1192_v43 }
  0x42   :  { %239 = vadd.xlane.f32.xlu0 %v139_v46  ;;  %v113_v46 = vmul.f32 %v1190_v42, %v1190_v42 }
  0x43   :  { %241 = vadd.xlane.f32.xlu1 %v140_v47  ;;  %v114_v47 = vmul.f32 %v1192_v43, %v1192_v43 }
  0x46   :  { %211 = vadd.xlane.f32.xlu0 %v125_v50  ;;  %v1198_v50 = vld [vmem:[#allocation2 + $0x1d0] sm:$0xff] }
  0x47   :  { %213 = vadd.xlane.f32.xlu1 %v126_v51  ;;  %1402 = vst [vmem:[#allocation10_spill] sm:$0xff] %v1198_v50  ;;  %v1200_v51 = vld [vmem:[#allocation2 + $0x1d8] sm:$0xff] }
  0x48   :  { %1403 = vst [vmem:[#allocation11_spill] sm:$0xff] %v1200_v51 }
  0x4a   :  { %179 = vadd.xlane.f32.xlu0 %v109_v54  ;;  %v161_v54 = vmul.f32 %v1198_v50, %v1198_v50 }
  0x4b   :  { %181 = vadd.xlane.f32.xlu1 %v110_v55  ;;  %v162_v55 = vmul.f32 %v1200_v51, %v1200_v51 }
  0x4e   :  { %275 = vadd.xlane.f32.xlu0 %v157_v58  ;;  %v1206_v58 = vld [vmem:[#allocation2 + $0x150] sm:$0xff] }
  0x4f   :  { %277 = vadd.xlane.f32.xlu1 %v158_v59  ;;  %1404 = vst [vmem:[#allocation12_spill] sm:$0xff] %v1206_v58  ;;  %v1208_v59 = vld [vmem:[#allocation2 + $0x158] sm:$0xff] }
  0x50   :  { %1405 = vst [vmem:[#allocation13_spill] sm:$0xff] %v1208_v59 }
  0x52   :  { %243 = vadd.xlane.f32.xlu0 %v141_v62  ;;  %v145_v62 = vmul.f32 %v1206_v58, %v1206_v58 }
  0x53   :  { %245 = vadd.xlane.f32.xlu1 %v142_v63  ;;  %v146_v63 = vmul.f32 %v1208_v59, %v1208_v59 }
  0x56   :  { %215 = vadd.xlane.f32.xlu0 %v127_v6  ;;  %v1214_v6 = vld [vmem:[#allocation2 + $0xe0] sm:$0xff] }
  0x57   :  { %217 = vadd.xlane.f32.xlu1 %v128_v7  ;;  %1406 = vst [vmem:[#allocation14_spill] sm:$0xff] %v1214_v6  ;;  %v1216_v7 = vld [vmem:[#allocation2 + $0xe8] sm:$0xff] }
  0x58   :  { %1407 = vst [vmem:[#allocation15_spill] sm:$0xff] %v1216_v7 }
  0x5a   :  { %183 = vadd.xlane.f32.xlu0 %v111_v14  ;;  %v131_v14 = vmul.f32 %v1214_v6, %v1214_v6 }
  0x5b   :  { %185 = vadd.xlane.f32.xlu1 %v112_v15  ;;  %v132_v15 = vmul.f32 %v1216_v7, %v1216_v7 }
  0x5e   :  { %279 = vadd.xlane.f32.xlu0 %v159_v22  ;;  %v1222_v22 = vld [vmem:[#allocation2 + $0x60] sm:$0xff] }
  0x5f   :  { %281 = vadd.xlane.f32.xlu1 %v160_v23  ;;  %1408 = vst [vmem:[#allocation16_spill] sm:$0xff] %v1222_v22  ;;  %v1224_v23 = vld [vmem:[#allocation2 + $0x68] sm:$0xff] }
  0x60   :  { %1409 = vst [vmem:[#allocation17_spill] sm:$0xff] %v1224_v23 }
  0x62   :  { %247 = vadd.xlane.f32.xlu0 %v143_v30  ;;  %v115_v30 = vmul.f32 %v1222_v22, %v1222_v22 }
  0x63   :  { %249 = vadd.xlane.f32.xlu1 %v144_v31  ;;  %v116_v31 = vmul.f32 %v1224_v23, %v1224_v23 }
  0x66   :  { %219 = vadd.xlane.f32.xlu0 %v129_v38  ;;  %v1230_v38 = vld [vmem:[#allocation2 + $0x1e0] sm:$0xff] }
  0x67   :  { %221 = vadd.xlane.f32.xlu1 %v130_v39  ;;  %1410 = vst [vmem:[#allocation18_spill] sm:$0xff] %v1230_v38  ;;  %v1232_v39 = vld [vmem:[#allocation2 + $0x1e8] sm:$0xff] }
  0x68   :  { %1411 = vst [vmem:[#allocation19_spill] sm:$0xff] %v1232_v39 }
  0x6a   :  { %187 = vadd.xlane.f32.xlu0 %v113_v46  ;;  %v163_v46 = vmul.f32 %v1230_v38, %v1230_v38 }
  0x6b   :  { %189 = vadd.xlane.f32.xlu1 %v114_v47  ;;  %v164_v47 = vmul.f32 %v1232_v39, %v1232_v39 }
  0x6e   :  { %283 = vadd.xlane.f32.xlu0 %v161_v54  ;;  %v1238_v54 = vld [vmem:[#allocation2 + $0x160] sm:$0xff] }
  0x6f   :  { %285 = vadd.xlane.f32.xlu1 %v162_v55  ;;  %1412 = vst [vmem:[#allocation20_spill] sm:$0xff] %v1238_v54  ;;  %v1240_v55 = vld [vmem:[#allocation2 + $0x168] sm:$0xff] }
  0x70   :  { %1413 = vst [vmem:[#allocation21_spill] sm:$0xff] %v1240_v55 }
  0x72   :  { %251 = vadd.xlane.f32.xlu0 %v145_v62  ;;  %v147_v62 = vmul.f32 %v1238_v54, %v1238_v54 }
  0x73   :  { %253 = vadd.xlane.f32.xlu1 %v146_v63  ;;  %v148_v63 = vmul.f32 %v1240_v55, %v1240_v55 }
  0x76   :  { %223 = vadd.xlane.f32.xlu0 %v131_v14  ;;  %v1246_v14 = vld [vmem:[#allocation2 + $0xf0] sm:$0xff] }
  0x77   :  { %225 = vadd.xlane.f32.xlu1 %v132_v15  ;;  %1414 = vst [vmem:[#allocation22_spill] sm:$0xff] %v1246_v14  ;;  %v1248_v15 = vld [vmem:[#allocation2 + $0xf8] sm:$0xff] }
  0x78   :  { %1415 = vst [vmem:[#allocation23_spill] sm:$0xff] %v1248_v15 }
  0x7a   :  { %191 = vadd.xlane.f32.xlu0 %v115_v30  ;;  %v133_v30 = vmul.f32 %v1246_v14, %v1246_v14 }
  0x7b   :  { %193 = vadd.xlane.f32.xlu1 %v116_v31  ;;  %v134_v31 = vmul.f32 %v1248_v15, %v1248_v15 }
  0x7e   :  { %287 = vadd.xlane.f32.xlu0 %v163_v46  ;;  %v1254_v46 = vld [vmem:[#allocation2 + $0x70] sm:$0xff] }
  0x7f   :  { %289 = vadd.xlane.f32.xlu1 %v164_v47  ;;  %1416 = vst [vmem:[#allocation24_spill] sm:$0xff] %v1254_v46  ;;  %v1256_v47 = vld [vmem:[#allocation2 + $0x78] sm:$0xff]  ;;  %v117_v55 = vmul.f32 %v1254_v46, %v1254_v46 }
  0x80   :  { %1417 = vst [vmem:[#allocation25_spill] sm:$0xff] %v1256_v47  ;;  %v118_v54 = vmul.f32 %v1256_v47, %v1256_v47 }
  0x82   :  { %255 = vadd.xlane.f32.xlu0 %v147_v62  ;;  %v1262_v62 = vld [vmem:[#allocation2 + $0x1f0] sm:$0xff] }
  0x83   :  { %257 = vadd.xlane.f32.xlu1 %v148_v63  ;;  %1418 = vst [vmem:[#allocation26_spill] sm:$0xff] %v1262_v62  ;;  %v1264_v63 = vld [vmem:[#allocation2 + $0x1f8] sm:$0xff]  ;;  %v165_v15 = vmul.f32 %v1262_v62, %v1262_v62 }
  0x84   :  { %1419 = vst [vmem:[#allocation27_spill] sm:$0xff] %v1264_v63  ;;  %v166_v14 = vmul.f32 %v1264_v63, %v1264_v63 }
  0x86   :  { %227 = vadd.xlane.f32.xlu0 %v133_v30  ;;  %v1270_v30 = vld [vmem:[#allocation2 + $0x170] sm:$0xff] }
  0x87   :  { %229 = vadd.xlane.f32.xlu1 %v134_v31  ;;  %1420 = vst [vmem:[#allocation28_spill] sm:$0xff] %v1270_v30  ;;  %v1272_v31 = vld [vmem:[#allocation2 + $0x178] sm:$0xff]  ;;  %v149_v47 = vmul.f32 %v1270_v30, %v1270_v30 }
  0x88   :  { %1421 = vst [vmem:[#allocation29_spill] sm:$0xff] %v1272_v31  ;;  %v150_v46 = vmul.f32 %v1272_v31, %v1272_v31 }
  0x8a   :  { %195 = vadd.xlane.f32.xlu0 %v117_v55 }
  0x8b   :  { %197 = vadd.xlane.f32.xlu1 %v118_v54  ;;  %v1281_v54 = vld [vmem:[%s1374_s1] sm:$0xff] }
  0x8c   :  { %1422 = vst [vmem:[#allocation30_spill] sm:$0xff] %v1281_v54  ;;  %v31_v55 = vmul.f32 %v1281_v54, %v1281_v54 }
  0x8e   :  { %291 = vadd.xlane.f32.xlu0 %v165_v15 }
  0x8f   :  { %293 = vadd.xlane.f32.xlu1 %v166_v14 }
  0x92   :  { %259 = vadd.xlane.f32.xlu0 %v149_v47 }
  0x93   :  { %261 = vadd.xlane.f32.xlu1 %v150_v46 }
  0x96   :  { %32 = vadd.xlane.f32.xlu0 %v31_v55 }
  0xa3   :  { %v200_v63 = vpop.xlane.xlu0 %199 }
  0xa4   :  { %v168_v15 = vpop.xlane.xlu1 %167  ;;  %805 = vrsqrt.f32 %v200_v63  ;;  %vm311_vm0 = vcmp.gt.f32.partialorder %v200_v63, 1e-10 }
  0xa5   :  { %807 = vrsqrt.f32 %v168_v15  ;;  %vm295_vm1 = vcmp.gt.f32.partialorder %v168_v15, 1e-10 }
  0xa7   :  { %v202_v14 = vpop.xlane.xlu0 %201 }
  0xa8   :  { %v170_v30 = vpop.xlane.xlu1 %169  ;;  %809 = vrsqrt.f32 %v202_v14  ;;  %vm312_vm2 = vcmp.gt.f32.partialorder %v202_v14, 1e-10 }
  0xa9   :  { %811 = vrsqrt.f32 %v170_v30  ;;  %vm296_vm3 = vcmp.gt.f32.partialorder %v170_v30, 1e-10 }
  0xab   :  { %v264_v31 = vpop.xlane.xlu0 %263 }
  0xac   :  { %v266_v62 = vpop.xlane.xlu1 %265  ;;  %813 = vrsqrt.f32 %v264_v31  ;;  %vm343_vm4 = vcmp.gt.f32.partialorder %v264_v31, 1e-10 }
  0xad   :  { %815 = vrsqrt.f32 %v266_v62  ;;  %vm344_vm5 = vcmp.gt.f32.partialorder %v266_v62, 1e-10 }
  0xae   :  { %v806_v39 = vpop.eup %805 }
  0xaf   :  { %v808_v38 = vpop.eup %807  ;;  %v232_v47 = vpop.xlane.xlu0 %231  ;;  %v439_v54 = vsel %vm311_vm0, %v806_v39, 100000.0 }
  0xb0   :  { %v234_v46 = vpop.xlane.xlu1 %233  ;;  %817 = vrsqrt.f32 %v232_v47  ;;  %v423_v23 = vsel %vm295_vm1, %v808_v38, 100000.0  ;;  %v503_v51 = vmul.f32 %v439_v54, %v1022_v0  ;;  %v673_v0 = vld [vmem:[%s1373_s0] sm:$0xff]  ;;  %vm327_vm6 = vcmp.gt.f32.partialorder %v232_v47, 1e-10  ;;  %s989_s0 = smov [#allocation5]  }
  0xb1   :  { %819 = vrsqrt.f32 %v234_v46  ;;  %v487_v63 = vmul.f32 %v423_v23, %v1024_v1  ;;  %vm328_vm7 = vcmp.gt.f32.partialorder %v234_v46, 1e-10  ;;  %s745_s28 = sshll.u32 %s989_s0, 4  ;;  %s746_s28 = int_to_ptr.vmem [resolvable:$true] %s745_s28 }
  0xb2   :  { %v810_v55 = vpop.eup %809  ;;  %s959_s29 = scalar_lea.vmem %s746_s28, 256  ;;  %p964_p9 = scmp.lt.s32.totalorder %s746_s28, %s746_s28 }
  0xb3   :  { %v812_v22 = vpop.eup %811  ;;  %v440_v7 = vsel %vm312_vm2, %v810_v55, 100000.0  ;;  %v204_v6 = vpop.xlane.xlu0 %203  ;;  %p960_p8 = scmp.ne.s32.totalorder %s746_s28, %s959_s29  ;;  %p965_p10 = scmp.lt.s32.totalorder %s959_s29, %s959_s29 }
  0xb4   :  { %v206_v59 = vpop.xlane.xlu1 %205  ;;  %v424_v58 = vsel %vm296_vm3, %v812_v22, 100000.0  ;;  %821 = vrsqrt.f32 %v204_v6  ;;  %v504_v50 = vmul.f32 %v440_v7, %v1026_v2  ;;  %vm313_vm8 = vcmp.gt.f32.partialorder %v204_v6, 1e-10 }
  0xb5   :  { %823 = vrsqrt.f32 %v206_v59  ;;  %v488_v39 = vmul.f32 %v424_v58, %v1032_v5  ;;  %v988_v58 = vmov 0   ;;  %vm314_vm9 = vcmp.gt.f32.partialorder %v206_v59, 1e-10  ;;  %p966_p11 = por %p965_p10, %p964_p9 }
  0xb6   :  { %v814_v15 = vpop.eup %813  ;;  %v559_v43 = vpack.c.bf16 %v504_v50, %v503_v51  ;;  %803 = vset.pattern.permute.xlu1 %v988_v58  ;;  %804 = vset.pattern.permute.xlu0 %v988_v58 }
  0xb7   :  { %v816_v38 = vpop.eup %815  ;;  %v471_v14 = vsel %vm343_vm4, %v814_v15, 100000.0  ;;  %v172_v55 = vpop.xlane.xlu0 %171  ;;  %v551_v42 = vpack.c.bf16 %v488_v39, %v487_v63  ;;  %683 = vperm.xlu1 %803, %v673_v0   ;;  %p967_p12 = pnand %p966_p11, %p960_p8 }
  0xb8   :  { %v174_v30 = vpop.xlane.xlu1 %173  ;;  %v472_v22 = vsel %vm344_vm5, %v816_v38, 100000.0  ;;  %825 = vrsqrt.f32 %v172_v55  ;;  %762 = vmatprep.subr.bf16.mxu0 %v559_v43  ;;  %v535_v1 = vmul.f32 %v471_v14, %v1038_v8  ;;  %vm297_vm10 = vcmp.gt.f32.partialorder %v172_v55, 1e-10 }
  0xb9   :  { %827 = vrsqrt.f32 %v174_v30  ;;  %v536_v2 = vmul.f32 %v472_v22, %v1040_v9  ;;  %763 = vmatpush3.bf16.xpose.msra.mxu0 %v551_v42  ;;  %vm298_vm11 = vcmp.gt.f32.partialorder %v174_v30, 1e-10 }
  0xba   :  { %v818_v5 = vpop.eup %817 }
  0xbb   :  { %v820_v7 = vpop.eup %819  ;;  %v455_v50 = vsel %vm327_vm6, %v818_v5, 100000.0  ;;  %v268_v51 = vpop.xlane.xlu0 %267  ;;  %v575_v62 = vpack.c.bf16 %v536_v2, %v535_v1 }
  0xbc   :  { %v270_v23 = vpop.xlane.xlu1 %269  ;;  %v456_v31 = vsel %vm328_vm7, %v820_v7, 100000.0  ;;  %829 = vrsqrt.f32 %v268_v51  ;;  %v519_v8 = vmul.f32 %v455_v50, %v1046_v12  ;;  %vm345_vm12 = vcmp.gt.f32.partialorder %v268_v51, 1e-10 }
  0xbd   :  { %831 = vrsqrt.f32 %v270_v23  ;;  %780 = vmatprep.subr.bf16.mxu1 %v575_v62  ;;  %v520_v9 = vmul.f32 %v456_v31, %v1048_v13  ;;  %vm346_vm13 = vcmp.gt.f32.partialorder %v270_v23, 1e-10 }
  0xbe   :  { %v822_v43 = vpop.eup %821 }
  0xbf   :  { %v824_v42 = vpop.eup %823  ;;  %v441_v54 = vsel %vm313_vm8, %v822_v43, 100000.0  ;;  %v236_v47 = vpop.xlane.xlu0 %235  ;;  %v567_v63 = vpack.c.bf16 %v520_v9, %v519_v8 }
  0xc0   :  { %v238_v46 = vpop.xlane.xlu1 %237  ;;  %v505_v39 = vmul.f32 %v441_v54, %v1054_v16  ;;  %v442_v15 = vsel %vm314_vm9, %v824_v42, 100000.0  ;;  %833 = vrsqrt.f32 %v236_v47  ;;  %vm329_vm14 = vcmp.gt.f32.partialorder %v236_v47, 1e-10 }
  0xc1   :  { %v506_v38 = vmul.f32 %v442_v15, %v1056_v17  ;;  %835 = vrsqrt.f32 %v238_v46  ;;  %781 = vmatpush3.bf16.xpose.msra.mxu1 %v567_v63  ;;  %vm330_vm15 = vcmp.gt.f32.partialorder %v238_v46, 1e-10 }
  0xc2   :  { %v826_v14 = vpop.eup %825 }
  0xc3   :  { %v828_v12 = vpop.eup %827  ;;  %v425_v13 = vsel %vm297_vm10, %v826_v14, 100000.0  ;;  %v208_v6 = vpop.xlane.xlu0 %207  ;;  %v560_v0 = vpack.c.bf16 %v506_v38, %v505_v39 }
  0xc4   :  { %v210_v22 = vpop.xlane.xlu1 %209  ;;  %v489_v59 = vmul.f32 %v425_v13, %v1062_v20  ;;  %v426_v1 = vsel %vm298_vm11, %v828_v12, 100000.0  ;;  %837 = vrsqrt.f32 %v208_v6  ;;  %vm315_vm0 = vcmp.gt.f32.partialorder %v208_v6, 1e-10 }
  0xc5   :  { %v490_v16 = vmul.f32 %v426_v1, %v1064_v21  ;;  %839 = vrsqrt.f32 %v210_v22  ;;  %764 = vmatprep.subr.bf16.mxu0 %v560_v0  ;;  %vm316_vm1 = vcmp.gt.f32.partialorder %v210_v22, 1e-10 }
  0xc6   :  { %v830_v2 = vpop.eup %829 }
  0xc7   :  { %v832_v17 = vpop.eup %831  ;;  %v473_v5 = vsel %vm345_vm12, %v830_v2, 100000.0  ;;  %v176_v55 = vpop.xlane.xlu0 %175  ;;  %v552_v7 = vpack.c.bf16 %v490_v16, %v489_v59 }
  0xc8   :  { %v178_v58 = vpop.xlane.xlu1 %177  ;;  %v537_v30 = vmul.f32 %v473_v5, %v1070_v24  ;;  %v474_v50 = vsel %vm346_vm13, %v832_v17, 100000.0  ;;  %841 = vrsqrt.f32 %v176_v55  ;;  %vm299_vm2 = vcmp.gt.f32.partialorder %v176_v55, 1e-10 }
  0xc9   :  { %v538_v20 = vmul.f32 %v474_v50, %v1072_v25  ;;  %843 = vrsqrt.f32 %v178_v58  ;;  %765 = vmatpush3.bf16.xpose.msra.mxu0 %v552_v7  ;;  %vm300_vm3 = vcmp.gt.f32.partialorder %v178_v58, 1e-10 }
  0xca   :  { %v834_v62 = vpop.eup %833 }
  0xcb   :  { %v836_v21 = vpop.eup %835  ;;  %v457_v31 = vsel %vm329_vm14, %v834_v62, 100000.0  ;;  %v272_v51 = vpop.xlane.xlu0 %271  ;;  %v576_v9 = vpack.c.bf16 %v538_v20, %v537_v30 }
  0xcc   :  { %v274_v8 = vpop.xlane.xlu1 %273  ;;  %v521_v23 = vmul.f32 %v457_v31, %v1078_v28  ;;  %v458_v43 = vsel %vm330_vm15, %v836_v21, 100000.0  ;;  %845 = vrsqrt.f32 %v272_v51  ;;  %vm347_vm4 = vcmp.gt.f32.partialorder %v272_v51, 1e-10 }
  0xcd   :  { %v522_v24 = vmul.f32 %v458_v43, %v1080_v29  ;;  %847 = vrsqrt.f32 %v274_v8  ;;  %782 = vmatprep.subr.bf16.mxu1 %v576_v9  ;;  %vm348_vm5 = vcmp.gt.f32.partialorder %v274_v8, 1e-10 }
  0xce   :  { %v838_v42 = vpop.eup %837 }
  0xcf   :  { %v840_v25 = vpop.eup %839  ;;  %v443_v54 = vsel %vm315_vm0, %v838_v42, 100000.0  ;;  %v240_v47 = vpop.xlane.xlu0 %239  ;;  %v568_v39 = vpack.c.bf16 %v522_v24, %v521_v23 }
  0xd0   :  { %v242_v63 = vpop.xlane.xlu1 %241  ;;  %v507_v46 = vmul.f32 %v443_v54, %v1086_v32  ;;  %v444_v15 = vsel %vm316_vm1, %v840_v25, 100000.0  ;;  %849 = vrsqrt.f32 %v240_v47  ;;  %vm331_vm6 = vcmp.gt.f32.partialorder %v240_v47, 1e-10 }
  0xd1   :  { %v508_v28 = vmul.f32 %v444_v15, %v1088_v33  ;;  %851 = vrsqrt.f32 %v242_v63  ;;  %783 = vmatpush3.bf16.xpose.msra.mxu1 %v568_v39  ;;  %vm332_vm7 = vcmp.gt.f32.partialorder %v242_v63, 1e-10 }
  0xd2   :  { %v842_v38 = vpop.eup %841 }
  0xd3   :  { %v844_v29 = vpop.eup %843  ;;  %v427_v14 = vsel %vm299_vm2, %v842_v38, 100000.0  ;;  %v212_v12 = vpop.xlane.xlu0 %211  ;;  %v561_v6 = vpack.c.bf16 %v508_v28, %v507_v46 }
  0xd4   :  { %v214_v13 = vpop.xlane.xlu1 %213  ;;  %v491_v22 = vmul.f32 %v427_v14, %v1094_v36  ;;  %v428_v0 = vsel %vm300_vm3, %v844_v29, 100000.0  ;;  %853 = vrsqrt.f32 %v212_v12  ;;  %vm317_vm8 = vcmp.gt.f32.partialorder %v212_v12, 1e-10 }
  0xd5   :  { %v492_v32 = vmul.f32 %v428_v0, %v1096_v37  ;;  %855 = vrsqrt.f32 %v214_v13  ;;  %766 = vmatprep.subr.bf16.mxu0 %v561_v6  ;;  %vm318_vm9 = vcmp.gt.f32.partialorder %v214_v13, 1e-10 }
  0xd6   :  { %v846_v59 = vpop.eup %845 }
  0xd7   :  { %v848_v33 = vpop.eup %847  ;;  %v475_v1 = vsel %vm347_vm4, %v846_v59, 100000.0  ;;  %v180_v16 = vpop.xlane.xlu0 %179  ;;  %v553_v17 = vpack.c.bf16 %v492_v32, %v491_v22 }
  0xd8   :  { %v182_v2 = vpop.xlane.xlu1 %181  ;;  %v539_v5 = vmul.f32 %v475_v1, %v1102_v40  ;;  %v476_v55 = vsel %vm348_vm5, %v848_v33, 100000.0  ;;  %857 = vrsqrt.f32 %v180_v16  ;;  %vm301_vm10 = vcmp.gt.f32.partialorder %v180_v16, 1e-10 }
  0xd9   :  { %v540_v36 = vmul.f32 %v476_v55, %v1104_v41  ;;  %859 = vrsqrt.f32 %v182_v2  ;;  %767 = vmatpush3.bf16.xpose.msra.mxu0 %v553_v17  ;;  %vm302_vm11 = vcmp.gt.f32.partialorder %v182_v2, 1e-10 }
  0xda   :  { %v850_v58 = vpop.eup %849 }
  0xdb   :  { %v852_v37 = vpop.eup %851  ;;  %v459_v7 = vsel %vm331_vm6, %v850_v58, 100000.0  ;;  %v276_v30 = vpop.xlane.xlu0 %275  ;;  %v577_v20 = vpack.c.bf16 %v540_v36, %v539_v5 }
  0xdc   :  { %v278_v50 = vpop.xlane.xlu1 %277  ;;  %v523_v62 = vmul.f32 %v459_v7, %v1110_v44  ;;  %v460_v21 = vsel %vm332_vm7, %v852_v37, 100000.0  ;;  %861 = vrsqrt.f32 %v276_v30  ;;  %vm349_vm12 = vcmp.gt.f32.partialorder %v276_v30, 1e-10 }
  0xdd   :  { %v524_v40 = vmul.f32 %v460_v21, %v1112_v45  ;;  %863 = vrsqrt.f32 %v278_v50  ;;  %784 = vmatprep.subr.bf16.mxu1 %v577_v20  ;;  %vm350_vm13 = vcmp.gt.f32.partialorder %v278_v50, 1e-10 }
  0xde   :  { %v854_v31 = vpop.eup %853 }
  0xdf   :  { %v856_v41 = vpop.eup %855  ;;  %v445_v51 = vsel %vm317_vm8, %v854_v31, 100000.0  ;;  %v244_v8 = vpop.xlane.xlu0 %243  ;;  %v569_v23 = vpack.c.bf16 %v524_v40, %v523_v62 }
  0xe0   :  { %v246_v9 = vpop.xlane.xlu1 %245  ;;  %v509_v43 = vmul.f32 %v445_v51, %v1118_v48  ;;  %v446_v24 = vsel %vm318_vm9, %v856_v41, 100000.0  ;;  %865 = vrsqrt.f32 %v244_v8  ;;  %vm333_vm14 = vcmp.gt.f32.partialorder %v244_v8, 1e-10 }
  0xe1   :  { %v510_v44 = vmul.f32 %v446_v24, %v1120_v49  ;;  %867 = vrsqrt.f32 %v246_v9  ;;  %785 = vmatpush3.bf16.xpose.msra.mxu1 %v569_v23  ;;  %vm334_vm15 = vcmp.gt.f32.partialorder %v246_v9, 1e-10 }
  0xe2   :  { %v858_v42 = vpop.eup %857 }
  0xe3   :  { %v860_v45 = vpop.eup %859  ;;  %v429_v25 = vsel %vm301_vm10, %v858_v42, 100000.0  ;;  %v216_v54 = vpop.xlane.xlu0 %215  ;;  %v562_v63 = vpack.c.bf16 %v510_v44, %v509_v43 }
  0xe4   :  { %v218_v47 = vpop.xlane.xlu1 %217  ;;  %v493_v39 = vmul.f32 %v429_v25, %v1126_v52  ;;  %v430_v46 = vsel %vm302_vm11, %v860_v45, 100000.0  ;;  %869 = vrsqrt.f32 %v216_v54  ;;  %vm319_vm0 = vcmp.gt.f32.partialorder %v216_v54, 1e-10 }
  0xe5   :  { %v494_v48 = vmul.f32 %v430_v46, %v1128_v53  ;;  %871 = vrsqrt.f32 %v218_v47  ;;  %768 = vmatprep.subr.bf16.mxu0 %v562_v63  ;;  %vm320_vm1 = vcmp.gt.f32.partialorder %v218_v47, 1e-10 }
  0xe6   :  { %v862_v15 = vpop.eup %861 }
  0xe7   :  { %v864_v49 = vpop.eup %863  ;;  %v477_v28 = vsel %vm349_vm12, %v862_v15, 100000.0  ;;  %v184_v38 = vpop.xlane.xlu0 %183  ;;  %v554_v14 = vpack.c.bf16 %v494_v48, %v493_v39 }
  0xe8   :  { %v186_v29 = vpop.xlane.xlu1 %185  ;;  %v541_v12 = vmul.f32 %v477_v28, %v1134_v56  ;;  %v478_v13 = vsel %vm350_vm13, %v864_v49, 100000.0  ;;  %873 = vrsqrt.f32 %v184_v38  ;;  %vm303_vm2 = vcmp.gt.f32.partialorder %v184_v38, 1e-10 }
  0xe9   :  { %v542_v52 = vmul.f32 %v478_v13, %v1136_v57  ;;  %875 = vrsqrt.f32 %v186_v29  ;;  %769 = vmatpush3.bf16.xpose.msra.mxu0 %v554_v14  ;;  %vm304_vm3 = vcmp.gt.f32.partialorder %v186_v29, 1e-10  ;;  %v1423_v13 = vld [vmem:[#allocation8_spill] sm:$0xff] }
  0xea   :  { %v866_v6 = vpop.eup %865 }
  0xeb   :  { %v868_v53 = vpop.eup %867  ;;  %v461_v22 = vsel %vm333_vm14, %v866_v6, 100000.0  ;;  %v280_v0 = vpop.xlane.xlu0 %279  ;;  %v578_v59 = vpack.c.bf16 %v542_v52, %v541_v12 }
  0xec   :  { %v282_v32 = vpop.xlane.xlu1 %281  ;;  %v525_v33 = vmul.f32 %v461_v22, %v1142_v60  ;;  %v462_v1 = vsel %vm334_vm15, %v868_v53, 100000.0  ;;  %877 = vrsqrt.f32 %v280_v0  ;;  %vm351_vm4 = vcmp.gt.f32.partialorder %v280_v0, 1e-10  ;;  %v1424_v53 = vld [vmem:[#allocation9_spill] sm:$0xff] }
  0xed   :  { %v526_v56 = vmul.f32 %v462_v1, %v1144_v61  ;;  %879 = vrsqrt.f32 %v282_v32  ;;  %786 = vmatprep.subr.bf16.mxu1 %v578_v59  ;;  %vm352_vm5 = vcmp.gt.f32.partialorder %v282_v32, 1e-10  ;;  %v1425_v1 = vld [vmem:[#allocation10_spill] sm:$0xff] }
  0xee   :  { %v870_v16 = vpop.eup %869 }
  0xef   :  { %v872_v57 = vpop.eup %871  ;;  %v447_v2 = vsel %vm319_vm0, %v870_v16, 100000.0  ;;  %v248_v17 = vpop.xlane.xlu0 %247  ;;  %v570_v55 = vpack.c.bf16 %v526_v56, %v525_v33 }
  0xf0   :  { %v250_v5 = vpop.xlane.xlu1 %249  ;;  %v511_v36 = vmul.f32 %v447_v2, %v1150_v3  ;;  %v448_v58 = vsel %vm320_vm1, %v872_v57, 100000.0  ;;  %881 = vrsqrt.f32 %v248_v17  ;;  %vm335_vm6 = vcmp.gt.f32.partialorder %v248_v17, 1e-10  ;;  %v1426_v57 = vld [vmem:[#allocation11_spill] sm:$0xff] }
  0xf1   :  { %v512_v60 = vmul.f32 %v448_v58, %v1152_v4  ;;  %883 = vrsqrt.f32 %v250_v5  ;;  %787 = vmatpush3.bf16.xpose.msra.mxu1 %v570_v55  ;;  %vm336_vm7 = vcmp.gt.f32.partialorder %v250_v5, 1e-10 }
  0xf2   :  { %v874_v37 = vpop.eup %873 }
  0xf3   :  { %v876_v61 = vpop.eup %875  ;;  %v431_v7 = vsel %vm303_vm2, %v874_v37, 100000.0  ;;  %v220_v30 = vpop.xlane.xlu0 %219  ;;  %v563_v20 = vpack.c.bf16 %v512_v60, %v511_v36  ;;  %v1427_v37 = vld [vmem:[#allocation12_spill] sm:$0xff] }
  0xf4   :  { %v222_v50 = vpop.xlane.xlu1 %221  ;;  %v495_v62 = vmul.f32 %v431_v7, %v1158_v10  ;;  %v432_v21 = vsel %vm304_vm3, %v876_v61, 100000.0  ;;  %885 = vrsqrt.f32 %v220_v30  ;;  %vm321_vm8 = vcmp.gt.f32.partialorder %v220_v30, 1e-10  ;;  %v1428_v30 = vld [vmem:[#allocation13_spill] sm:$0xff] }
  0xf5   :  { %v496_v3 = vmul.f32 %v432_v21, %v1160_v11  ;;  %887 = vrsqrt.f32 %v222_v50  ;;  %770 = vmatprep.subr.bf16.mxu0 %v563_v20  ;;  %vm322_vm9 = vcmp.gt.f32.partialorder %v222_v50, 1e-10 }
  0xf6   :  { %v878_v40 = vpop.eup %877 }
  0xf7   :  { %v880_v4 = vpop.eup %879  ;;  %v479_v31 = vsel %vm351_vm4, %v878_v40, 100000.0  ;;  %v188_v41 = vpop.xlane.xlu0 %187  ;;  %v555_v8 = vpack.c.bf16 %v496_v3, %v495_v62 }
  0xf8   :  { %v190_v51 = vpop.xlane.xlu1 %189  ;;  %v543_v9 = vmul.f32 %v479_v31, %v1166_v18  ;;  %v480_v23 = vsel %vm352_vm5, %v880_v4, 100000.0  ;;  %889 = vrsqrt.f32 %v188_v41  ;;  %vm305_vm10 = vcmp.gt.f32.partialorder %v188_v41, 1e-10  ;;  %v1429_v31 = vld [vmem:[#allocation14_spill] sm:$0xff] }
  0xf9   :  { %v544_v10 = vmul.f32 %v480_v23, %v1168_v19  ;;  %891 = vrsqrt.f32 %v190_v51  ;;  %771 = vmatpush3.bf16.xpose.msra.mxu0 %v555_v8  ;;  %vm306_vm11 = vcmp.gt.f32.partialorder %v190_v51, 1e-10  ;;  %v1430_v8 = vld [vmem:[#allocation15_spill] sm:$0xff] }
  0xfa   :  { %v882_v43 = vpop.eup %881 }
  0xfb   :  { %v884_v11 = vpop.eup %883  ;;  %v463_v24 = vsel %vm335_vm6, %v882_v43, 100000.0  ;;  %v284_v44 = vpop.xlane.xlu0 %283  ;;  %v579_v45 = vpack.c.bf16 %v544_v10, %v543_v9 }
  0xfc   :  { %v286_v42 = vpop.xlane.xlu1 %285  ;;  %v527_v25 = vmul.f32 %v463_v24, %v1174_v26  ;;  %v464_v54 = vsel %vm336_vm7, %v884_v11, 100000.0  ;;  %893 = vrsqrt.f32 %v284_v44  ;;  %vm353_vm12 = vcmp.gt.f32.partialorder %v284_v44, 1e-10 }
  0xfd   :  { %v528_v18 = vmul.f32 %v464_v54, %v1176_v27  ;;  %895 = vrsqrt.f32 %v286_v42  ;;  %788 = vmatprep.subr.bf16.mxu1 %v579_v45  ;;  %vm354_vm13 = vcmp.gt.f32.partialorder %v286_v42, 1e-10  ;;  %v1431_v42 = vld [vmem:[#allocation16_spill] sm:$0xff]  ;;  %v1432_v54 = vld [vmem:[#allocation17_spill] sm:$0xff] }
  0xfe   :  { %v886_v47 = vpop.eup %885 }
  0xff   :  { %v888_v19 = vpop.eup %887  ;;  %v449_v63 = vsel %vm321_vm8, %v886_v47, 100000.0  ;;  %v252_v39 = vpop.xlane.xlu0 %251  ;;  %v571_v48 = vpack.c.bf16 %v528_v18, %v527_v25 }
 0x100   :  { %v254_v46 = vpop.xlane.xlu1 %253  ;;  %v513_v15 = vmul.f32 %v449_v63, %v1182_v34  ;;  %v450_v49 = vsel %vm322_vm9, %v888_v19, 100000.0  ;;  %897 = vrsqrt.f32 %v252_v39  ;;  %vm337_vm14 = vcmp.gt.f32.partialorder %v252_v39, 1e-10 }
 0x101   :  { %v514_v26 = vmul.f32 %v450_v49, %v1184_v35  ;;  %899 = vrsqrt.f32 %v254_v46  ;;  %789 = vmatpush3.bf16.xpose.msra.mxu1 %v571_v48  ;;  %vm338_vm15 = vcmp.gt.f32.partialorder %v254_v46, 1e-10 }
 0x102   :  { %v890_v28 = vpop.eup %889 }
 0x103   :  { %v892_v27 = vpop.eup %891  ;;  %v433_v38 = vsel %vm305_vm10, %v890_v28, 100000.0  ;;  %v224_v29 = vpop.xlane.xlu0 %223  ;;  %v564_v12 = vpack.c.bf16 %v514_v26, %v513_v15  ;;  %v1433_v15 = vld [vmem:[#allocation18_spill] sm:$0xff]  ;;  %v1434_v28 = vld [vmem:[#allocation19_spill] sm:$0xff] }
 0x104   :  { %v226_v14 = vpop.xlane.xlu1 %225  ;;  %v497_v52 = vmul.f32 %v433_v38, %v1423_v13  ;;  %v434_v6 = vsel %vm306_vm11, %v892_v27, 100000.0  ;;  %901 = vrsqrt.f32 %v224_v29  ;;  %vm323_vm0 = vcmp.gt.f32.partialorder %v224_v29, 1e-10 }
 0x105   :  { %v498_v34 = vmul.f32 %v434_v6, %v1424_v53  ;;  %903 = vrsqrt.f32 %v226_v14  ;;  %772 = vmatprep.subr.bf16.mxu0 %v564_v12  ;;  %vm324_vm1 = vcmp.gt.f32.partialorder %v226_v14, 1e-10  ;;  %v1435_v6 = vld [vmem:[#allocation20_spill] sm:$0xff] }
 0x106   :  { %v894_v22 = vpop.eup %893 }
 0x107   :  { %v896_v35 = vpop.eup %895  ;;  %v481_v0 = vsel %vm353_vm12, %v894_v22, 100000.0  ;;  %v192_v32 = vpop.xlane.xlu0 %191  ;;  %v556_v33 = vpack.c.bf16 %v498_v34, %v497_v52  ;;  %v1436_v22 = vld [vmem:[#allocation21_spill] sm:$0xff] }
 0x108   :  { %v194_v59 = vpop.xlane.xlu1 %193  ;;  %v545_v56 = vmul.f32 %v481_v0, %v1425_v1  ;;  %v482_v16 = vsel %vm354_vm13, %v896_v35, 100000.0  ;;  %905 = vrsqrt.f32 %v192_v32  ;;  %vm307_vm2 = vcmp.gt.f32.partialorder %v192_v32, 1e-10 }
 0x109   :  { %v546_v2 = vmul.f32 %v482_v16, %v1426_v57  ;;  %907 = vrsqrt.f32 %v194_v59  ;;  %773 = vmatpush3.bf16.xpose.msra.mxu0 %v556_v33  ;;  %vm308_vm3 = vcmp.gt.f32.partialorder %v194_v59, 1e-10  ;;  %v1437_v16 = vld [vmem:[#allocation22_spill] sm:$0xff] }
 0x10a   :  { %v898_v17 = vpop.eup %897 }
 0x10b   :  { %v900_v5 = vpop.eup %899  ;;  %v465_v55 = vsel %vm337_vm14, %v898_v17, 100000.0  ;;  %v288_v36 = vpop.xlane.xlu0 %287  ;;  %v580_v60 = vpack.c.bf16 %v546_v2, %v545_v56  ;;  %v1438_v17 = vld [vmem:[#allocation23_spill] sm:$0xff] }
 0x10c   :  { %v290_v58 = vpop.xlane.xlu1 %289  ;;  %v529_v61 = vmul.f32 %v465_v55, %v1427_v37  ;;  %v466_v7 = vsel %vm338_vm15, %v900_v5, 100000.0  ;;  %909 = vrsqrt.f32 %v288_v36  ;;  %vm355_vm4 = vcmp.gt.f32.partialorder %v288_v36, 1e-10 }
 0x10d   :  { %v530_v50 = vmul.f32 %v466_v7, %v1428_v30  ;;  %911 = vrsqrt.f32 %v290_v58  ;;  %790 = vmatprep.subr.bf16.mxu1 %v580_v60  ;;  %vm356_vm5 = vcmp.gt.f32.partialorder %v290_v58, 1e-10 }
 0x10e   :  { %v902_v20 = vpop.eup %901 }
 0x10f   :  { %v904_v62 = vpop.eup %903  ;;  %v451_v21 = vsel %vm323_vm0, %v902_v20, 100000.0  ;;  %v256_v3 = vpop.xlane.xlu0 %255  ;;  %v572_v4 = vpack.c.bf16 %v530_v50, %v529_v61  ;;  %v1439_v61 = vld [vmem:[#allocation24_spill] sm:$0xff]  ;;  %v1440_v50 = vld [vmem:[#allocation25_spill] sm:$0xff] }
 0x110   :  { %v258_v40 = vpop.xlane.xlu1 %257  ;;  %v515_v41 = vmul.f32 %v451_v21, %v1429_v31  ;;  %v452_v51 = vsel %vm324_vm1, %v904_v62, 100000.0  ;;  %913 = vrsqrt.f32 %v256_v3  ;;  %vm339_vm6 = vcmp.gt.f32.partialorder %v256_v3, 1e-10 }
 0x111   :  { %v516_v9 = vmul.f32 %v452_v51, %v1430_v8  ;;  %915 = vrsqrt.f32 %v258_v40  ;;  %791 = vmatpush3.bf16.xpose.msra.mxu1 %v572_v4  ;;  %vm340_vm7 = vcmp.gt.f32.partialorder %v258_v40, 1e-10  ;;  %v1441_v4 = vld [vmem:[#allocation26_spill] sm:$0xff]  ;;  %v1442_v51 = vld [vmem:[#allocation27_spill] sm:$0xff] }
 0x112   :  { %v906_v23 = vpop.eup %905 }
 0x113   :  { %v908_v10 = vpop.eup %907  ;;  %v435_v43 = vsel %vm307_vm2, %v906_v23, 100000.0  ;;  %v228_v11 = vpop.xlane.xlu0 %227  ;;  %v565_v44 = vpack.c.bf16 %v516_v9, %v515_v41 }
 0x114   :  { %v230_v24 = vpop.xlane.xlu1 %229  ;;  %v499_v45 = vmul.f32 %v435_v43, %v1431_v42  ;;  %v436_v25 = vsel %vm308_vm3, %v908_v10, 100000.0  ;;  %917 = vrsqrt.f32 %v228_v11  ;;  %vm325_vm8 = vcmp.gt.f32.partialorder %v228_v11, 1e-10  ;;  %v1443_v11 = vld [vmem:[#allocation28_spill] sm:$0xff]  ;;  %v1444_v42 = vld [vmem:[#allocation29_spill] sm:$0xff] }
 0x115   :  { %v500_v18 = vmul.f32 %v436_v25, %v1432_v54  ;;  %919 = vrsqrt.f32 %v230_v24  ;;  %774 = vmatprep.subr.bf16.mxu0 %v565_v44  ;;  %vm326_vm9 = vcmp.gt.f32.partialorder %v230_v24, 1e-10 }
 0x116   :  { %v910_v47 = vpop.eup %909 }
 0x117   :  { %v912_v19 = vpop.eup %911  ;;  %v483_v63 = vsel %vm355_vm4, %v910_v47, 100000.0  ;;  %v196_v39 = vpop.xlane.xlu0 %195  ;;  %v557_v48 = vpack.c.bf16 %v500_v18, %v499_v45  ;;  %v1445_v47 = vld [vmem:[#allocation30_spill] sm:$0xff] }
 0x118   :  { %v198_v46 = vpop.xlane.xlu1 %197  ;;  %v547_v49 = vmul.f32 %v483_v63, %v1433_v15  ;;  %v484_v26 = vsel %vm356_vm5, %v912_v19, 100000.0  ;;  %921 = vrsqrt.f32 %v196_v39  ;;  %vm309_vm10 = vcmp.gt.f32.partialorder %v196_v39, 1e-10 }
 0x119   :  { %v548_v27 = vmul.f32 %v484_v26, %v1434_v28  ;;  %923 = vrsqrt.f32 %v198_v46  ;;  %775 = vmatpush3.bf16.xpose.msra.mxu0 %v557_v48  ;;  %vm310_vm11 = vcmp.gt.f32.partialorder %v198_v46, 1e-10  ;;  %v677_v39 = vlaneseq }
 0x11a   :  { %v914_v38 = vpop.eup %913 }
 0x11b   :  { %v916_v29 = vpop.eup %915  ;;  %v467_v14 = vsel %vm339_vm6, %v914_v38, 100000.0  ;;  %v292_v12 = vpop.xlane.xlu0 %291  ;;  %v581_v52 = vpack.c.bf16 %v548_v27, %v547_v49  ;;  %v678_v46 = vand.u32 127, %v677_v39 }
 0x11c   :  { %v294_v13 = vpop.xlane.xlu1 %293  ;;  %v531_v53 = vmul.f32 %v467_v14, %v1435_v6  ;;  %v468_v34 = vsel %vm340_vm7, %v916_v29, 100000.0  ;;  %925 = vrsqrt.f32 %v292_v12  ;;  %vm357_vm12 = vcmp.gt.f32.partialorder %v292_v12, 1e-10 }
 0x11d   :  { %v532_v35 = vmul.f32 %v468_v34, %v1436_v22  ;;  %927 = vrsqrt.f32 %v294_v13  ;;  %792 = vmatprep.subr.bf16.mxu1 %v581_v52  ;;  %vm358_vm13 = vcmp.gt.f32.partialorder %v294_v13, 1e-10  ;;  %v679_v15 = vadd.s32 128, %v678_v46 }
 0x11e   :  { %v918_v0 = vpop.eup %917  ;;  %v680_v49 = vadd.s32 256, %v678_v46  ;;  %v681_v52 = vadd.s32 384, %v678_v46 }
 0x11f   :  { %v920_v32 = vpop.eup %919  ;;  %v453_v59 = vsel %vm325_vm8, %v918_v0, 100000.0  ;;  %v260_v33 = vpop.xlane.xlu0 %259  ;;  %v573_v56 = vpack.c.bf16 %v532_v35, %v531_v53 }
 0x120   :  { %v262_v1 = vpop.xlane.xlu1 %261  ;;  %v517_v57 = vmul.f32 %v453_v59, %v1437_v16  ;;  %v454_v2 = vsel %vm326_vm9, %v920_v32, 100000.0  ;;  %929 = vrsqrt.f32 %v260_v33  ;;  %vm341_vm14 = vcmp.gt.f32.partialorder %v260_v33, 1e-10 }
 0x121   :  { %v518_v5 = vmul.f32 %v454_v2, %v1438_v17  ;;  %931 = vrsqrt.f32 %v262_v1  ;;  %793 = vmatpush3.bf16.xpose.msra.mxu1 %v573_v56  ;;  %vm342_vm15 = vcmp.gt.f32.partialorder %v262_v1, 1e-10 }
 0x122   :  { %v922_v55 = vpop.eup %921 }
 0x123   :  { %v924_v36 = vpop.eup %923  ;;  %v437_v58 = vsel %vm309_vm10, %v922_v55, 100000.0  ;;  %v33_v60 = vpop.xlane.xlu0 %32  ;;  %v566_v37 = vpack.c.bf16 %v518_v5, %v517_v57 }
 0x124   :  { %v501_v7 = vmul.f32 %v437_v58, %v1439_v61  ;;  %v438_v30 = vsel %vm310_vm11, %v924_v36, 100000.0  ;;  %933 = vrsqrt.f32 %v33_v60  ;;  %vm34_vm0 = vcmp.gt.f32.partialorder %v33_v60, 1e-10 }
 0x125   :  { %v502_v20 = vmul.f32 %v438_v30, %v1440_v50  ;;  %776 = vmatprep.subr.bf16.mxu0 %v566_v37 }
 0x126   :  { %v926_v62 = vpop.eup %925 }
 0x127   :  { %v928_v21 = vpop.eup %927  ;;  %v485_v3 = vsel %vm357_vm12, %v926_v62, 100000.0  ;;  %v558_v40 = vpack.c.bf16 %v502_v20, %v501_v7 }
 0x128   :  { %v549_v31 = vmul.f32 %v485_v3, %v1441_v4  ;;  %v486_v41 = vsel %vm358_vm13, %v928_v21, 100000.0 }
 0x129   :  { %v550_v8 = vmul.f32 %v486_v41, %v1442_v51  ;;  %777 = vmatpush3.bf16.xpose.msra.mxu0 %v558_v40 }
 0x12a   :  { %v930_v9 = vpop.eup %929 }
 0x12b   :  { %v932_v23 = vpop.eup %931  ;;  %v469_v10 = vsel %vm341_vm14, %v930_v9, 100000.0  ;;  %v582_v43 = vpack.c.bf16 %v550_v8, %v549_v31 }
 0x12c   :  { %v533_v24 = vmul.f32 %v469_v10, %v1443_v11  ;;  %v470_v44 = vsel %vm342_vm15, %v932_v23, 100000.0 }
 0x12d   :  { %v534_v45 = vmul.f32 %v470_v44, %v1444_v42  ;;  %794 = vmatprep.subr.bf16.mxu1 %v582_v43 }
 0x12e   :  { %v934_v25 = vpop.eup %933 }
 0x12f   :  { %v36_v54 = vsel %vm34_vm0, %v934_v25, 100000.0  ;;  %v574_v18 = vpack.c.bf16 %v534_v45, %v533_v24 }
 0x130   :  { %v37_v19 = vmul.f32 %v36_v54, %v1445_v47 }
 0x131   :  { %795 = vmatpush3.bf16.xpose.msra.mxu1 %v574_v18 }
 0x132   :  { %v38_v63 = vpack.c.bf16 %v37_v19, %v37_v19 }
 0x134   :  { %778 = vmatprep.mubr.bf16.mxu0 %v38_v63  ;;  %796 = vmatprep.mubr.bf16.mxu1 %v38_v63 }
 0x135   :  { %779 = vmatmul.mubr.bf16.vlgmr.msra.gmra.mrb[0].mxu0 %v38_v63 }
 0x136   :  { %v684_v48 = vpop.permute.xlu1 %683 }
 0x137   :  { %vm685_vm1 = vcmp.eq.s32.totalorder %v678_v46, %v684_v48  ;;  %vm686_vm2 = vcmp.eq.s32.totalorder %v679_v15, %v684_v48  ;;  %vm687_vm3 = vcmp.eq.s32.totalorder %v680_v49, %v684_v48  ;;  %vm688_vm4 = vcmp.eq.s32.totalorder %v681_v52, %v684_v48 }
 0x138   :  { %797 = vmatmul.mubr.bf16.vlgmr.msra.gmra.mrb[0].mxu1 %v38_v63 }
 0x208   :  { %v617_v26 = vpop.f32.mrb[0].mxu0 }
 0x209   :  { %v754_v28 = vclamps-f32 %v617_v26, 1.0  ;;  %v619_v27 = vpop.f32.mrb[1].mxu0 }
 0x20a   :  { %v755_v38 = vclamps-f32 %v619_v27, 1.0  ;;  %v621_v29 = vpop.f32.mrb[2].mxu0 }
 0x20b   :  { %v689_v14 = vsel %vm685_vm1, %v754_v28, 0.0  ;;  %v658_v12 = vpop.f32.mrb[0].mxu1  ;;  %v622_v13 = vpop.f32.mrb[3].mxu0 }
 0x20c   :  { %v690_v6 = vsel %vm686_vm2, %v755_v38, 0.0  ;;  %v756_v53 = vclamps-f32 %v658_v12, 1.0  ;;  %v660_v34 = vpop.f32.mrb[1].mxu1 }
 0x20d   :  { %v693_v22 = vadd.f32 %v690_v6, %v689_v14  ;;  %v757_v35 = vclamps-f32 %v660_v34, 1.0  ;;  %v662_v0 = vpop.f32.mrb[2].mxu1 }
 0x20e   :  { %v691_v32 = vsel %vm687_vm3, %v756_v53, 0.0  ;;  %v663_v59 = vpop.f32.mrb[3].mxu1 }
 0x20f   :  { %v694_v33 = vadd.f32 %v693_v22, %v691_v32  ;;  %v692_v1 = vsel %vm688_vm4, %v757_v35, 0.0 }
 0x211   :  { %v695_v56 = vadd.f32 %v694_v33, %v692_v1 }
 0x213   :  { %696 = vadd.xlane.f32.xlu0 %v695_v56 }
 0x2a0   :  { %v697_v16 = vpop.xlane.xlu0 %696 }
 0x2a1   :  { %v698_v57 = vmul.f32 %v697_v16, %v697_v16  ;;  %v708_v37 = vmul.f32 0.87758255, %v697_v16  ;;  %vm711_vm7 = vcmp.gt.f32.partialorder %v697_v16, 0.0 }
 0x2a3   :  { %v699_v2 = vsub.f32 1.0, %v698_v57 }
 0x2a5   :  { %v700_v17 = vmax.f32 %v699_v2, 0.0 }
 0x2a7   :  { %935 = vrsqrt.f32 %v700_v17  ;;  %vm703_vm5 = vcmp.eq.f32.partialorder %v700_v17, inf  ;;  %v706_v36 = vand.u32 2147483648, %v700_v17  ;;  %vm705_vm6 = vcmp.eq.f32.partialorder %v700_v17, 0.0 }
 0x2b1   :  { %v936_v5 = vpop.eup %935 }
 0x2b2   :  { %v702_v55 = vmul.f32 %v936_v5, %v700_v17 }
 0x2b4   :  { %v704_v58 = vsel %vm703_vm5, %v700_v17, %v702_v55 }
 0x2b5   :  { %v707_v60 = vsel %vm705_vm6, %v706_v36, %v704_v58 }
 0x2b6   :  { %v709_v61 = vmul.f32 0.47942555, %v707_v60 }
 0x2b8   :  { %v710_v7 = vsub.f32 %v708_v37, %v709_v61 }
 0x2ba   :  { %v712_v30 = vsel %vm711_vm7, %v710_v7, %v697_v16 }
 0x2bb   :  { %v713_v50 = vsel %vm685_vm1, %v712_v30, %v754_v28  ;;  %v714_v20 = vsel %vm686_vm2, %v712_v30, %v755_v38  ;;  %v715_v62 = vsel %vm687_vm3, %v712_v30, %v756_v53  ;;  %v716_v21 = vsel %vm688_vm4, %v712_v30, %v757_v35 }
 0x2bc   :  { %v717_v3 = vmul.f32 64.0, %v713_v50  ;;  %v718_v40 = vmul.f32 64.0, %v714_v20  ;;  %v719_v4 = vmul.f32 64.0, %v715_v62  ;;  %v720_v31 = vmul.f32 64.0, %v716_v21 }
 0x2be   :  { %v760_v41 = vpack.c.bf16 %v718_v40, %v717_v3  ;;  %v761_v51 = vpack.c.bf16 %v720_v31, %v719_v4 }
 0x2c0   :  { %737 = vst [vmem:[#allocation5] sm:$0xff] %v760_v41  ;;  %738 = vst [vmem:[#allocation5 + $0x8] sm:$0xff] %v761_v51 }
 0x2c1   :  { %970 = shalt.err (!%p967_p12)
}
 0x2c2   :  { %s971_s5 = scalar_lea.hbm %s1376_s3, 256 }
 0x2c3   :  { %p972_p13 = scmp.ne.s32.totalorder %s1376_s3, %s971_s5  ;;  %p975_p0 = scmp.lt.u32.totalorder %s971_s5, %s1376_s3 }
 0x2c5   :  { %p977_p1 = pnand %p975_p0, %p972_p13 }
 0x2c7   :  { %980 = shalt.err (!%p977_p1)
}
 0x2c8   :  { %748 = dma.vmem_to_hbm [thread:$0]  %s746_s28, 256, %s1376_s3, [#allocation4]  }
 0x2c9   :  { %983 = dma.done.wait [#allocation4], 256  }
 0x2ca   :  { %984 = vsyncadd [#allocation4], 4294967040 }
 0x2cb   :  { %752 = vsyncpa [#allocation3], 1 }
 0x2cc   :  { %753 = vsyncpa [#allocation4], 1 }

</bundles_post_ra>
